<compile_context>
chip_gen: v6e
topology: v6e:2x2x1
jax: 0.10.0
libtpu: 0.0.40
codegen_flags: <defaults>
</compile_context>

<pallas_src>
import functools
import math

import jax
import jax.numpy as jnp
from jax.experimental import pallas as pl
from jax.experimental.pallas import tpu as pltpu

_LANES = 128


def _vdropout_kernel(bits_ref, x_ref, o_ref, *, threshold: int, inv_keep: float, v: int):
    # bits_ref: (tr, 128) uint32  -- one draw per vector channel (channel = lane).
    # x_ref/o_ref: (tr, 128*v)    -- 128 full channels per row, lane-dense.
    lanes = bits_ref.shape[-1]            # 128
    width = x_ref.shape[-1]               # 128 * v

    bits = bits_ref[...]
    # keep iff bits < keep_prob * 2^32; fuse the 1/keep_prob scale (f32).
    keep_scaled = jnp.where(
        bits < jnp.uint32(threshold), jnp.float32(inv_keep), jnp.float32(0.0)
    )                                      # (tr, 128)

    # Expansion matrix E[c, l] = 1.0 iff lane l belongs to channel c (l // v == c),
    # built without integer division: 0 <= l - c*v < v.
    lane_i = jax.lax.broadcasted_iota(jnp.int32, (lanes, width), 1)
    chan_i = jax.lax.broadcasted_iota(jnp.int32, (lanes, width), 0)
    diff = lane_i - chan_i * v
    expand = jnp.logical_and(diff >= 0, diff < v).astype(jnp.float32)  # (128, 128*v)

    # Element-granularity mask via MXU: exactly one nonzero term per element -> exact.
    mask = jnp.dot(keep_scaled, expand, preferred_element_type=jnp.float32)  # (tr, width)

    x = x_ref[...].astype(jnp.float32)
    o_ref[...] = (x * mask).astype(o_ref.dtype)


def vdropout(
    x: jax.Array,
    drop_rate: float,
    key: jax.Array,
    *,
    training: bool = True,
) -> jax.Array:
    """Vector-channel dropout. x: [..., V]; one Bernoulli draw per x.shape[:-1]."""
    if not training or drop_rate == 0.0:
        return x
    if drop_rate >= 1.0:
        return jnp.zeros_like(x)

    keep_prob = 1.0 - drop_rate
    inv_keep = 1.0 / keep_prob
    # keep iff uniform uint32 bits < keep_prob * 2^32.
    threshold = min(int(keep_prob * (2 ** 32)), 2 ** 32 - 1)

    orig_shape = x.shape
    V = orig_shape[-1]
    M = math.prod(orig_shape[:-1])          # number of vector channels

    # Lane-dense rows of 128 full channels each (free reshape, NO transpose).
    R = pl.cdiv(M, _LANES)
    Mp = R * _LANES
    flat = x.reshape(M, V)
    if Mp != M:
        flat = jnp.pad(flat, ((0, Mp - M), (0, 0)))   # rare: pad channels to 128-mult
    x2d = flat.reshape(R, _LANES * V)

    # One uint32 per channel (padded channels get unused draws).
    bits = jax.random.bits(key, (R, _LANES), dtype=jnp.uint32)

    # Row-tile size: ~2 MiB of x per block; in+out+bits double buffers stay small.
    row_bytes = _LANES * V * x.dtype.itemsize
    tr_cap = max(8, ((2 * 1024 * 1024) // row_bytes) // 8 * 8)
    tr = R if R <= tr_cap else tr_cap
    grid = (pl.cdiv(R, tr),)

    out2d = pl.pallas_call(
        functools.partial(
            _vdropout_kernel, threshold=threshold, inv_keep=inv_keep, v=V
        ),
        out_shape=jax.ShapeDtypeStruct((R, _LANES * V), x.dtype),
        grid=grid,
        in_specs=[
            pl.BlockSpec((tr, _LANES), lambda i: (i, 0)),       # per-channel bits
            pl.BlockSpec((tr, _LANES * V), lambda i: (i, 0)),   # x, lane-dense rows
        ],
        out_specs=pl.BlockSpec((tr, _LANES * V), lambda i: (i, 0)),
        compiler_params=pltpu.CompilerParams(
            dimension_semantics=("parallel",),
        ),
    )(bits, x2d)

    out = out2d.reshape(Mp, V)
    if Mp != M:
        out = out[:M]
    return out.reshape(orig_shape)


if __name__ == "__main__":
    key = jax.random.PRNGKey(0)
    kx, kmask = jax.random.split(key)

    # GVP-style vector features: (batch, nodes, vector_channels, 3) -> 1024 channels.
    x = jax.random.normal(kx, (2, 64, 8, 3), dtype=jnp.float32)
    drop_rate = 0.25

    y = jax.block_until_ready(vdropout(x, drop_rate, kmask, training=True))

    # Every vector channel must be either entirely zeroed or entirely scaled by
    # 1/(1 - drop_rate), matching torch's per-channel Bernoulli broadcast.
    keep_prob = 1.0 - drop_rate
    x2 = x.reshape(-1, 3)
    y2 = y.reshape(-1, 3)
    scaled = x2 / keep_prob
    row_zero = jnp.all(y2 == 0.0, axis=-1)
    row_scaled = jnp.all(
        jnp.abs(y2 - scaled) <= 1e-5 * (1.0 + jnp.abs(scaled)), axis=-1
    )
    assert bool(jnp.all(row_zero | row_scaled)), "rows must be dropped or scaled together"

    # Non-degenerate drop fraction (1024 channels @ p=0.25 -> ~0.25 +/- 0.013).
    frac_dropped = float(jnp.mean(row_zero.astype(jnp.float32)))
    assert 0.05 < frac_dropped < 0.50, f"unexpected drop fraction {frac_dropped}"

    # Eval mode is identity.
    y_eval = jax.block_until_ready(vdropout(x, drop_rate, kmask, training=False))
    assert bool(jnp.all(y_eval == x))

    print("KERNEL_OK")
</pallas_src>

<mosaic_0001>
module attributes {stable_mosaic.version = 11 : i64} {
  func.func @_vdropout_kernel(%arg0: i32, %arg1: memref<8x128xi32, #tpu.memory_space<vmem>>, %arg2: memref<8x384xf32, #tpu.memory_space<vmem>>, %arg3: memref<8x384xf32, #tpu.memory_space<vmem>>) attributes {dimension_semantics = [#tpu.dimension_semantics<parallel>], iteration_bounds = array<i64: 1>, scalar_prefetch = 0 : i64, scratch_operands = 0 : i64, tpu.core_type = #tpu.core_type<tc>, window_params = [{transform_indices = @transform_0, window_bounds = array<i64: 8, 128>}, {transform_indices = @transform_1, window_bounds = array<i64: 8, 384>}, {transform_indices = @transform_2, window_bounds = array<i64: 8, 384>}]} {
    %c0 = arith.constant 0 : index
    %c0_0 = arith.constant 0 : index
    %0 = vector.load %arg1[%c0, %c0_0] : memref<8x128xi32, #tpu.memory_space<vmem>>, vector<8x128xi32>
    %c-1073741824_i32 = arith.constant -1073741824 : i32
    %1 = vector.broadcast %c-1073741824_i32 : i32 to vector<8x128xi32>
    %2 = arith.cmpi ult, %0, %1 : vector<8x128xi32>
    %cst = arith.constant 1.33333337 : f32
    %cst_1 = arith.constant 0.000000e+00 : f32
    %3 = vector.broadcast %cst : f32 to vector<8x128xf32>
    %4 = vector.broadcast %cst_1 : f32 to vector<8x128xf32>
    %5 = arith.select %2, %3, %4 : vector<8x128xi1>, vector<8x128xf32>
    %6 = tpu.iota {dimensions = array<i32: 1>} : vector<128x384xi32>
    %7 = tpu.iota {dimensions = array<i32: 0>} : vector<128x384xi32>
    %c3_i32 = arith.constant 3 : i32
    %8 = vector.broadcast %c3_i32 : i32 to vector<128x384xi32>
    %9 = arith.muli %7, %8 : vector<128x384xi32>
    %10 = arith.subi %6, %9 : vector<128x384xi32>
    %c0_i32 = arith.constant 0 : i32
    %11 = vector.broadcast %c0_i32 : i32 to vector<128x384xi32>
    %12 = arith.cmpi sge, %10, %11 : vector<128x384xi32>
    %c3_i32_2 = arith.constant 3 : i32
    %13 = vector.broadcast %c3_i32_2 : i32 to vector<128x384xi32>
    %14 = arith.cmpi slt, %10, %13 : vector<128x384xi32>
    %15 = arith.andi %12, %14 : vector<128x384xi1>
    %16 = arith.extui %15 : vector<128x384xi1> to vector<128x384xi32>
    %17 = arith.sitofp %16 : vector<128x384xi32> to vector<128x384xf32>
    %cst_3 = arith.constant dense<0.000000e+00> : vector<8x384xf32>
    %18 = tpu.matmul %5, %17, %cst_3 {dimension_numbers = #tpu.dot_dimension_numbers<[1], [0], [0], [1], [0, 0, 1, 1], [], []>} : vector<8x128xf32>, vector<128x384xf32>, vector<8x384xf32> -> vector<8x384xf32>
    %c0_4 = arith.constant 0 : index
    %c0_5 = arith.constant 0 : index
    %19 = vector.load %arg2[%c0_4, %c0_5] : memref<8x384xf32, #tpu.memory_space<vmem>>, vector<8x384xf32>
    %20 = arith.mulf %19, %18 : vector<8x384xf32>
    %c0_6 = arith.constant 0 : index
    %c0_7 = arith.constant 0 : index
    %21 = vector.load %arg3[%c0_6, %c0_7] : memref<8x384xf32, #tpu.memory_space<vmem>>, vector<8x384xf32>
    tpu.vector_store %arg3[%c0_6, %c0_7], %20 {strides = array<i32>} : memref<8x384xf32, #tpu.memory_space<vmem>>, vector<8x384xf32>,
    return
  }
  func.func @transform_0(%arg0: i32) -> (i32, i32) {
    %c0_i32 = arith.constant 0 : i32
    %c0_i32_0 = arith.constant 0 : i32
    return %arg0, %c0_i32 : i32, i32
  }
  func.func @transform_1(%arg0: i32) -> (i32, i32) {
    %c0_i32 = arith.constant 0 : i32
    %c0_i32_0 = arith.constant 0 : i32
    return %arg0, %c0_i32 : i32, i32
  }
  func.func @transform_2(%arg0: i32) -> (i32, i32) {
    %c0_i32 = arith.constant 0 : i32
    %c0_i32_0 = arith.constant 0 : i32
    return %arg0, %c0_i32 : i32, i32
  }
}

</mosaic_0001>

<bundles_post_ra>
// kernel: tpu_custom_call.1
= control target key start
LH: loop header
LB: loop body
LE: loop exit
PB: predicated region body
PF: predicated region fallthrough
CT: control target
= control target key end

     0   :  { %7 = vsyncpa [#allocation3], 0  ;;  %s997_s0 = inlined_call_operand.hbm [shape: u32[8,128], index: 0, kind: input, shape index: {}]   ;;  %s998_s1 = inlined_call_operand.hbm [shape: f32[8,384], index: 1, kind: input, shape index: {}]   ;;  %s999_s2 = inlined_call_operand.hbm [shape: f32[8,384], index: 2, kind: output, shape index: {}]  }
   0x1   :  { %8 = vsyncpa [#allocation6], 0 }
   0x2   :  { %9 = vsyncpa [#allocation4], 0  ;;  %s753_s9 = smov [#allocation2]   ;;  %s754_s11 = smov [#allocation5]  }
   0x3   :  { %s16_s10 = sshll.u32 %s753_s9, 4  ;;  %s26_s12 = sshll.u32 %s754_s11, 4  ;;  %s17_s10 = int_to_ptr.vmem [resolvable:$true] %s16_s10  ;;  %s27_s12 = int_to_ptr.vmem [resolvable:$true] %s26_s12 }
   0x4   :  { %s695_s13 = scalar_lea.vmem %s17_s10, 128  ;;  %p700_p1 = scmp.lt.s32.totalorder %s17_s10, %s17_s10 }
   0x5   :  { %p696_p0 = scmp.ne.s32.totalorder %s17_s10, %s695_s13  ;;  %p701_p2 = scmp.lt.s32.totalorder %s695_s13, %s695_s13 }
   0x7   :  { %p702_p3 = por %p701_p2, %p700_p1 }
   0x9   :  { %p703_p4 = pnand %p702_p3, %p696_p0 }
   0xb   :  { %706 = shalt.err (!%p703_p4)
}
   0xc   :  { %19 = dma.hbm_to_vmem [thread:$0]  %s997_s0, 128, %s17_s10, [#allocation3]  }
   0xd   :  { %s715_s16 = scalar_lea.vmem %s27_s12, 384  ;;  %p720_p6 = scmp.lt.s32.totalorder %s27_s12, %s27_s12 }
   0xe   :  { %p716_p5 = scmp.ne.s32.totalorder %s27_s12, %s715_s16  ;;  %p721_p7 = scmp.lt.s32.totalorder %s715_s16, %s715_s16 }
  0x10   :  { %p722_p8 = por %p721_p7, %p720_p6 }
  0x12   :  { %p723_p9 = pnand %p722_p8, %p716_p5 }
  0x14   :  { %726 = shalt.err (!%p723_p9)
}
  0x15   :  { %29 = dma.hbm_to_vmem [thread:$0]  %s998_s1, 384, %s27_s12, [#allocation6]  }
  0x16   :  { %747 = dma.done.wait [#allocation3], 128  }
  0x17   :  { %748 = vsyncadd [#allocation3], 4294967168  ;;  %v39_v0 = vlaneseq }
  0x18   :  { %749 = dma.done.wait [#allocation6], 384  }
  0x19   :  { %750 = vsyncadd [#allocation6], 4294966912  ;;  %v755_v1 = vmov 0.0   ;;  %v783_v2 = vand.u32 127, %v39_v0  ;;  %v785_v3 = vshrl.u32 %v39_v0, 7  ;;  %vm756_vm0 = vmmov 0  }
  0x1a   :  { %645 = vmatprep.subr.mxu1 %v755_v1  ;;  %428 = vmatprep.mubr.f32.mxu0 %v755_v1  ;;  %v757_v24 = vmov 1.0   ;;  %s759_s0 = smov [#allocation7]  }
  0x1b   :  { %677 = vmatprep.mubr.msk.f32.mxu1 %vm756_vm0, %v755_v1  ;;  %v789_v4 = vadd.s32 128, %v783_v2  ;;  %v59_v5 = vadd.s32 120, %v785_v3  ;;  %v793_v6 = vadd.s32 256, %v783_v2  ;;  %v58_v7 = vadd.s32 112, %v785_v3  ;;  %s520_s1 = sshll.u32 %s759_s0, 4  ;;  %s521_s1 = int_to_ptr.vmem [resolvable:$true] %s520_s1 }
  0x1c   :  { %v57_v8 = vadd.s32 104, %v785_v3  ;;  %v56_v9 = vadd.s32 96, %v785_v3  ;;  %v55_v14 = vadd.s32 88, %v785_v3  ;;  %v54_v15 = vadd.s32 80, %v785_v3  ;;  %s727_s19 = scalar_lea.vmem %s521_s1, 384  ;;  %p732_p11 = scmp.lt.s32.totalorder %s521_s1, %s521_s1 }
  0x1d   :  { %v75_v10 = vmul.u32 3, %v59_v5  ;;  %v74_v11 = vmul.u32 3, %v58_v7  ;;  %v53_v25 = vadd.s32 72, %v785_v3  ;;  %v52_v32 = vadd.s32 64, %v785_v3  ;;  %p728_p10 = scmp.ne.s32.totalorder %s521_s1, %s727_s19  ;;  %p733_p12 = scmp.lt.s32.totalorder %s727_s19, %s727_s19 }
  0x1e   :  { %v73_v12 = vmul.u32 3, %v57_v8  ;;  %v72_v13 = vmul.u32 3, %v56_v9  ;;  %v51_v39 = vadd.s32 56, %v785_v3  ;;  %v50_v42 = vadd.s32 48, %v785_v3 }
  0x1f   :  { %v122_v16 = vsub.s32 %v789_v4, %v75_v10  ;;  %v121_v17 = vsub.s32 %v783_v2, %v75_v10  ;;  %v123_v18 = vsub.s32 %v793_v6, %v75_v10  ;;  %v119_v19 = vsub.s32 %v789_v4, %v74_v11  ;;  %p734_p13 = por %p733_p12, %p732_p11 }
  0x20   :  { %v118_v20 = vsub.s32 %v783_v2, %v74_v11  ;;  %v120_v21 = vsub.s32 %v793_v6, %v74_v11  ;;  %v116_v22 = vsub.s32 %v789_v4, %v73_v12  ;;  %v115_v23 = vsub.s32 %v783_v2, %v73_v12 }
  0x21   :  { %vm170_vm1 = vcmp.ge.s32.totalorder %v122_v16, 0  ;;  %vm218_vm2 = vcmp.lt.s32.totalorder %v122_v16, 3  ;;  %vm169_vm3 = vcmp.ge.s32.totalorder %v121_v17, 0  ;;  %vm217_vm4 = vcmp.lt.s32.totalorder %v121_v17, 3  ;;  %p735_p0 = pnand %p734_p13, %p728_p10 }
  0x22   :  { %vm266_vm5 = vmand %vm170_vm1, %vm218_vm2  ;;  %vm171_vm6 = vcmp.ge.s32.totalorder %v123_v18, 0  ;;  %vm219_vm7 = vcmp.lt.s32.totalorder %v123_v18, 3  ;;  %vm167_vm8 = vcmp.ge.s32.totalorder %v119_v19, 0  ;;  %vm215_vm9 = vcmp.lt.s32.totalorder %v119_v19, 3 }
  0x23   :  { %578 = vmatprep.subr.msk.mxu0 %vm266_vm5, %v757_v24  ;;  %vm265_vm10 = vmand %vm169_vm3, %vm217_vm4  ;;  %vm166_vm11 = vcmp.ge.s32.totalorder %v118_v20, 0  ;;  %vm214_vm12 = vcmp.lt.s32.totalorder %v118_v20, 3  ;;  %vm168_vm14 = vcmp.ge.s32.totalorder %v120_v21, 0  ;;  %vm216_vm15 = vcmp.lt.s32.totalorder %v120_v21, 3 }
  0x24   :  { %579 = vmatpush1.msk.msra.mxu0 %vm265_vm10, %v757_v24  ;;  %vm267_vm13 = vmand %vm171_vm6, %vm219_vm7  ;;  %vm164_vm0 = vcmp.ge.s32.totalorder %v116_v22, 0  ;;  %vm212_vm1 = vcmp.lt.s32.totalorder %v116_v22, 3  ;;  %vm163_vm5 = vcmp.ge.s32.totalorder %v115_v23, 0  ;;  %v117_v26 = vsub.s32 %v793_v6, %v73_v12 }
  0x25   :  { %646 = vmatpush3.msk.msra.mxu1 %vm267_vm13, %v757_v24  ;;  %vm263_vm2 = vmand %vm167_vm8, %vm215_vm9  ;;  %v113_v27 = vsub.s32 %v789_v4, %v72_v13  ;;  %v112_v28 = vsub.s32 %v783_v2, %v72_v13  ;;  %vm211_vm4 = vcmp.lt.s32.totalorder %v115_v23, 3  ;;  %v114_v29 = vsub.s32 %v793_v6, %v72_v13 }
  0x26   :  { %580 = vmatprep.subr.msk.mxu0 %vm263_vm2, %v757_v24  ;;  %647 = vmatprep.subr.mxu1 %v755_v1  ;;  %vm262_vm3 = vmand %vm166_vm11, %vm214_vm12  ;;  %v71_v30 = vmul.u32 3, %v55_v14  ;;  %v70_v31 = vmul.u32 3, %v54_v15  ;;  %vm165_vm7 = vcmp.ge.s32.totalorder %v117_v26, 0  ;;  %vm213_vm8 = vcmp.lt.s32.totalorder %v117_v26, 3 }
  0x27   :  { %581 = vmatpush1.msk.msra.mxu0 %vm262_vm3, %v757_v24  ;;  %vm264_vm6 = vmand %vm168_vm14, %vm216_vm15  ;;  %vm161_vm10 = vcmp.ge.s32.totalorder %v113_v27, 0  ;;  %vm209_vm13 = vcmp.lt.s32.totalorder %v113_v27, 3  ;;  %vm160_vm11 = vcmp.ge.s32.totalorder %v112_v28, 0  ;;  %vm208_vm14 = vcmp.lt.s32.totalorder %v112_v28, 3  ;;  %v507_v27 = vld [vmem:[#allocation5 + $0x10] sm:$0xff] }
  0x28   :  { %648 = vmatpush3.msk.msra.mxu1 %vm264_vm6, %v757_v24  ;;  %vm260_vm9 = vmand %vm164_vm0, %vm212_vm1  ;;  %v110_v33 = vsub.s32 %v789_v4, %v71_v30  ;;  %v109_v34 = vsub.s32 %v783_v2, %v71_v30  ;;  %v111_v35 = vsub.s32 %v793_v6, %v71_v30  ;;  %vm162_vm0 = vcmp.ge.s32.totalorder %v114_v29, 0 }
  0x29   :  { %582 = vmatprep.subr.msk.mxu0 %vm260_vm9, %v757_v24  ;;  %649 = vmatprep.subr.mxu1 %v755_v1  ;;  %vm259_vm12 = vmand %vm163_vm5, %vm211_vm4  ;;  %vm210_vm1 = vcmp.lt.s32.totalorder %v114_v29, 3  ;;  %v107_v36 = vsub.s32 %v789_v4, %v70_v31  ;;  %v69_v37 = vmul.u32 3, %v53_v25  ;;  %v106_v38 = vsub.s32 %v783_v2, %v70_v31  ;;  %v506_v29 = vld [vmem:[#allocation5 + $0x8] sm:$0xff] }
  0x2a   :  { %583 = vmatpush1.msk.msra.mxu0 %vm259_vm12, %v757_v24  ;;  %vm261_vm15 = vmand %vm165_vm7, %vm213_vm8  ;;  %vm158_vm5 = vcmp.ge.s32.totalorder %v110_v33, 0  ;;  %vm206_vm3 = vcmp.lt.s32.totalorder %v110_v33, 3  ;;  %vm157_vm6 = vcmp.ge.s32.totalorder %v109_v34, 0  ;;  %vm205_vm7 = vcmp.lt.s32.totalorder %v109_v34, 3 }
  0x2b   :  { %650 = vmatpush3.msk.msra.mxu1 %vm261_vm15, %v757_v24  ;;  %vm257_vm2 = vmand %vm161_vm10, %vm209_vm13  ;;  %v108_v40 = vsub.s32 %v793_v6, %v70_v31  ;;  %v68_v41 = vmul.u32 3, %v52_v32  ;;  %vm159_vm9 = vcmp.ge.s32.totalorder %v111_v35, 0  ;;  %vm207_vm10 = vcmp.lt.s32.totalorder %v111_v35, 3 }
  0x2c   :  { %584 = vmatprep.subr.msk.mxu0 %vm257_vm2, %v757_v24  ;;  %651 = vmatprep.subr.mxu1 %v755_v1  ;;  %vm256_vm4 = vmand %vm160_vm11, %vm208_vm14  ;;  %vm155_vm11 = vcmp.ge.s32.totalorder %v107_v36, 0  ;;  %vm203_vm12 = vcmp.lt.s32.totalorder %v107_v36, 3  ;;  %v104_v43 = vsub.s32 %v789_v4, %v69_v37  ;;  %v103_v44 = vsub.s32 %v783_v2, %v69_v37 }
  0x2d   :  { %585 = vmatpush1.msk.msra.mxu0 %vm256_vm4, %v757_v24  ;;  %vm258_vm8 = vmand %vm162_vm0, %vm210_vm1  ;;  %vm154_vm15 = vcmp.ge.s32.totalorder %v106_v38, 0  ;;  %vm202_vm0 = vcmp.lt.s32.totalorder %v106_v38, 3  ;;  %v105_v45 = vsub.s32 %v793_v6, %v69_v37  ;;  %v67_v46 = vmul.u32 3, %v51_v39 }
  0x2e   :  { %652 = vmatpush3.msk.msra.mxu1 %vm258_vm8, %v757_v24  ;;  %vm254_vm13 = vmand %vm158_vm5, %vm206_vm3  ;;  %vm156_vm2 = vcmp.ge.s32.totalorder %v108_v40, 0  ;;  %vm204_vm5 = vcmp.lt.s32.totalorder %v108_v40, 3  ;;  %v101_v47 = vsub.s32 %v789_v4, %v68_v41  ;;  %vm152_vm4 = vcmp.ge.s32.totalorder %v104_v43, 0 }
  0x2f   :  { %586 = vmatprep.subr.msk.mxu0 %vm254_vm13, %v757_v24  ;;  %653 = vmatprep.subr.mxu1 %v755_v1  ;;  %vm253_vm14 = vmand %vm157_vm6, %vm205_vm7  ;;  %vm200_vm6 = vcmp.lt.s32.totalorder %v104_v43, 3  ;;  %v100_v48 = vsub.s32 %v783_v2, %v68_v41  ;;  %v49_v49 = vadd.s32 40, %v785_v3  ;;  %vm151_vm8 = vcmp.ge.s32.totalorder %v103_v44, 0 }
  0x30   :  { %587 = vmatpush1.msk.msra.mxu0 %vm253_vm14, %v757_v24  ;;  %vm255_vm1 = vmand %vm159_vm9, %vm207_vm10  ;;  %vm199_vm9 = vcmp.lt.s32.totalorder %v103_v44, 3  ;;  %v102_v50 = vsub.s32 %v793_v6, %v68_v41  ;;  %v66_v51 = vmul.u32 3, %v50_v42  ;;  %vm153_vm13 = vcmp.ge.s32.totalorder %v105_v45, 0 }
  0x31   :  { %654 = vmatpush3.msk.msra.mxu1 %vm255_vm1, %v757_v24  ;;  %vm251_vm3 = vmand %vm155_vm11, %vm203_vm12  ;;  %vm201_vm11 = vcmp.lt.s32.totalorder %v105_v45, 3  ;;  %v98_v52 = vsub.s32 %v789_v4, %v67_v46  ;;  %vm149_vm14 = vcmp.ge.s32.totalorder %v101_v47, 0  ;;  %v97_v53 = vsub.s32 %v783_v2, %v67_v46 }
  0x32   :  { %588 = vmatprep.subr.msk.mxu0 %vm251_vm3, %v757_v24  ;;  %655 = vmatprep.subr.mxu1 %v755_v1  ;;  %vm250_vm7 = vmand %vm154_vm15, %vm202_vm0  ;;  %vm197_vm15 = vcmp.lt.s32.totalorder %v101_v47, 3  ;;  %v48_v54 = vadd.s32 32, %v785_v3  ;;  %vm148_vm1 = vcmp.ge.s32.totalorder %v100_v48, 0  ;;  %v99_v55 = vsub.s32 %v793_v6, %v67_v46 }
  0x33   :  { %589 = vmatpush1.msk.msra.mxu0 %vm250_vm7, %v757_v24  ;;  %vm252_vm10 = vmand %vm156_vm2, %vm204_vm5  ;;  %vm196_vm2 = vcmp.lt.s32.totalorder %v100_v48, 3  ;;  %v65_v56 = vmul.u32 3, %v49_v49  ;;  %vm150_vm3 = vcmp.ge.s32.totalorder %v102_v50, 0  ;;  %v95_v57 = vsub.s32 %v789_v4, %v66_v51 }
  0x34   :  { %656 = vmatpush3.msk.msra.mxu1 %vm252_vm10, %v757_v24  ;;  %vm248_vm12 = vmand %vm152_vm4, %vm200_vm6  ;;  %vm198_vm4 = vcmp.lt.s32.totalorder %v102_v50, 3  ;;  %vm146_vm7 = vcmp.ge.s32.totalorder %v98_v52, 0  ;;  %v94_v58 = vsub.s32 %v783_v2, %v66_v51  ;;  %vm145_vm10 = vcmp.ge.s32.totalorder %v97_v53, 0 }
  0x35   :  { %590 = vmatprep.subr.msk.mxu0 %vm248_vm12, %v757_v24  ;;  %657 = vmatprep.subr.mxu1 %v755_v1  ;;  %vm247_vm0 = vmand %vm151_vm8, %vm199_vm9  ;;  %vm194_vm8 = vcmp.lt.s32.totalorder %v98_v52, 3  ;;  %v96_v59 = vsub.s32 %v793_v6, %v66_v51  ;;  %v64_v60 = vmul.u32 3, %v48_v54  ;;  %vm147_vm12 = vcmp.ge.s32.totalorder %v99_v55, 0 }
  0x36   :  { %591 = vmatpush1.msk.msra.mxu0 %vm247_vm0, %v757_v24  ;;  %vm249_vm5 = vmand %vm153_vm13, %vm201_vm11  ;;  %vm193_vm13 = vcmp.lt.s32.totalorder %v97_v53, 3  ;;  %v92_v61 = vsub.s32 %v789_v4, %v65_v56  ;;  %v47_v62 = vadd.s32 24, %v785_v3  ;;  %vm143_vm0 = vcmp.ge.s32.totalorder %v95_v57, 0 }
  0x37   :  { %658 = vmatpush3.msk.msra.mxu1 %vm249_vm5, %v757_v24  ;;  %vm245_vm6 = vmand %vm149_vm14, %vm197_vm15  ;;  %vm195_vm14 = vcmp.lt.s32.totalorder %v99_v55, 3  ;;  %v91_v63 = vsub.s32 %v783_v2, %v65_v56  ;;  %v46_v0 = vadd.s32 16, %v785_v3  ;;  %vm142_vm5 = vcmp.ge.s32.totalorder %v94_v58, 0 }
  0x38   :  { %592 = vmatprep.subr.msk.mxu0 %vm245_vm6, %v757_v24  ;;  %659 = vmatprep.subr.mxu1 %v755_v1  ;;  %vm244_vm9 = vmand %vm148_vm1, %vm196_vm2  ;;  %vm191_vm1 = vcmp.lt.s32.totalorder %v95_v57, 3  ;;  %v93_v5 = vsub.s32 %v793_v6, %v65_v56  ;;  %vm144_vm6 = vcmp.ge.s32.totalorder %v96_v59, 0  ;;  %v89_v7 = vsub.s32 %v789_v4, %v64_v60 }
  0x39   :  { %593 = vmatpush1.msk.msra.mxu0 %vm244_vm9, %v757_v24  ;;  %vm246_vm11 = vmand %vm150_vm3, %vm198_vm4  ;;  %vm190_vm3 = vcmp.lt.s32.totalorder %v94_v58, 3  ;;  %v88_v8 = vsub.s32 %v783_v2, %v64_v60  ;;  %vm140_vm9 = vcmp.ge.s32.totalorder %v92_v61, 0  ;;  %v63_v9 = vmul.u32 3, %v47_v62 }
  0x3a   :  { %660 = vmatpush3.msk.msra.mxu1 %vm246_vm11, %v757_v24  ;;  %vm242_vm15 = vmand %vm146_vm7, %vm194_vm8  ;;  %vm192_vm7 = vcmp.lt.s32.totalorder %v96_v59, 3  ;;  %v45_v10 = vadd.s32 8, %v785_v3  ;;  %vm139_vm11 = vcmp.ge.s32.totalorder %v91_v63, 0  ;;  %v90_v11 = vsub.s32 %v793_v6, %v64_v60 }
  0x3b   :  { %594 = vmatprep.subr.msk.mxu0 %vm242_vm15, %v757_v24  ;;  %661 = vmatprep.subr.mxu1 %v755_v1  ;;  %vm241_vm2 = vmand %vm145_vm10, %vm193_vm13  ;;  %vm188_vm10 = vcmp.lt.s32.totalorder %v92_v61, 3  ;;  %v62_v12 = vmul.u32 3, %v46_v0  ;;  %vm141_vm15 = vcmp.ge.s32.totalorder %v93_v5, 0  ;;  %v86_v13 = vsub.s32 %v789_v4, %v63_v9 }
  0x3c   :  { %595 = vmatpush1.msk.msra.mxu0 %vm241_vm2, %v757_v24  ;;  %vm243_vm4 = vmand %vm147_vm12, %vm195_vm14  ;;  %vm187_vm12 = vcmp.lt.s32.totalorder %v91_v63, 3  ;;  %vm137_vm2 = vcmp.ge.s32.totalorder %v89_v7, 0  ;;  %v85_v14 = vsub.s32 %v783_v2, %v63_v9  ;;  %v87_v15 = vsub.s32 %v793_v6, %v63_v9 }
  0x3d   :  { %662 = vmatpush3.msk.msra.mxu1 %vm243_vm4, %v757_v24  ;;  %vm239_vm8 = vmand %vm143_vm0, %vm191_vm1  ;;  %vm189_vm0 = vcmp.lt.s32.totalorder %v93_v5, 3  ;;  %vm136_vm4 = vcmp.ge.s32.totalorder %v88_v8, 0  ;;  %v61_v16 = vmul.u32 3, %v45_v10  ;;  %v83_v17 = vsub.s32 %v789_v4, %v62_v12 }
  0x3e   :  { %596 = vmatprep.subr.msk.mxu0 %vm239_vm8, %v757_v24  ;;  %663 = vmatprep.subr.mxu1 %v755_v1  ;;  %vm238_vm13 = vmand %vm142_vm5, %vm190_vm3  ;;  %vm185_vm5 = vcmp.lt.s32.totalorder %v89_v7, 3  ;;  %vm138_vm8 = vcmp.ge.s32.totalorder %v90_v11, 0  ;;  %v82_v18 = vsub.s32 %v783_v2, %v62_v12  ;;  %v84_v19 = vsub.s32 %v793_v6, %v62_v12 }
  0x3f   :  { %597 = vmatpush1.msk.msra.mxu0 %vm238_vm13, %v757_v24  ;;  %vm240_vm14 = vmand %vm144_vm6, %vm192_vm7  ;;  %vm184_vm6 = vcmp.lt.s32.totalorder %v88_v8, 3  ;;  %vm134_vm13 = vcmp.ge.s32.totalorder %v86_v13, 0  ;;  %v60_v20 = vmul.u32 3, %v785_v3  ;;  %v80_v21 = vsub.s32 %v789_v4, %v61_v16 }
  0x40   :  { %664 = vmatpush3.msk.msra.mxu1 %vm240_vm14, %v757_v24  ;;  %vm236_vm1 = vmand %vm140_vm9, %vm188_vm10  ;;  %vm186_vm9 = vcmp.lt.s32.totalorder %v90_v11, 3  ;;  %vm133_vm14 = vcmp.ge.s32.totalorder %v85_v14, 0  ;;  %v79_v22 = vsub.s32 %v783_v2, %v61_v16  ;;  %v81_v3 = vsub.s32 %v793_v6, %v61_v16 }
  0x41   :  { %598 = vmatprep.subr.msk.mxu0 %vm236_vm1, %v757_v24  ;;  %665 = vmatprep.subr.mxu1 %v755_v1  ;;  %vm235_vm3 = vmand %vm139_vm11, %vm187_vm12  ;;  %vm182_vm11 = vcmp.lt.s32.totalorder %v86_v13, 3  ;;  %vm135_vm1 = vcmp.ge.s32.totalorder %v87_v15, 0  ;;  %v77_v23 = vsub.s32 %v789_v4, %v60_v20  ;;  %v76_v25 = vsub.s32 %v783_v2, %v60_v20  ;;  %v36_v2 = vld [vmem:[#allocation2] sm:$0xff] }
  0x42   :  { %599 = vmatpush1.msk.msra.mxu0 %vm235_vm3, %v757_v24  ;;  %vm237_vm7 = vmand %vm141_vm15, %vm189_vm0  ;;  %vm181_vm15 = vcmp.lt.s32.totalorder %v85_v14, 3  ;;  %vm131_vm3 = vcmp.ge.s32.totalorder %v83_v17, 0  ;;  %v78_v26 = vsub.s32 %v793_v6, %v60_v20  ;;  %v758_v4 = vmov 1.3333334   ;;  %v505_v6 = vld [vmem:[#allocation5] sm:$0xff] }
  0x43   :  { %666 = vmatpush3.msk.msra.mxu1 %vm237_vm7, %v757_v24  ;;  %vm233_vm10 = vmand %vm137_vm2, %vm185_vm5  ;;  %vm183_vm2 = vcmp.lt.s32.totalorder %v87_v15, 3  ;;  %vm130_vm7 = vcmp.ge.s32.totalorder %v82_v18, 0 }
  0x44   :  { %600 = vmatprep.subr.msk.mxu0 %vm233_vm10, %v757_v24  ;;  %667 = vmatprep.subr.mxu1 %v755_v1  ;;  %vm232_vm12 = vmand %vm136_vm4, %vm184_vm6  ;;  %vm179_vm4 = vcmp.lt.s32.totalorder %v83_v17, 3  ;;  %vm132_vm10 = vcmp.ge.s32.totalorder %v84_v19, 0 }
  0x45   :  { %601 = vmatpush1.msk.msra.mxu0 %vm232_vm12, %v757_v24  ;;  %vm234_vm0 = vmand %vm138_vm8, %vm186_vm9  ;;  %vm178_vm8 = vcmp.lt.s32.totalorder %v82_v18, 3  ;;  %vm128_vm12 = vcmp.ge.s32.totalorder %v80_v21, 0 }
  0x46   :  { %668 = vmatpush3.msk.msra.mxu1 %vm234_vm0, %v757_v24  ;;  %vm230_vm5 = vmand %vm134_vm13, %vm182_vm11  ;;  %vm180_vm13 = vcmp.lt.s32.totalorder %v84_v19, 3  ;;  %vm176_vm0 = vcmp.lt.s32.totalorder %v80_v21, 3 }
  0x47   :  { %602 = vmatprep.subr.msk.mxu0 %vm230_vm5, %v757_v24  ;;  %669 = vmatprep.subr.mxu1 %v755_v1  ;;  %vm229_vm6 = vmand %vm133_vm14, %vm181_vm15  ;;  %vm127_vm15 = vcmp.ge.s32.totalorder %v79_v22, 0  ;;  %vm129_vm5 = vcmp.ge.s32.totalorder %v81_v3, 0 }
  0x48   :  { %603 = vmatpush1.msk.msra.mxu0 %vm229_vm6, %v757_v24  ;;  %vm231_vm9 = vmand %vm135_vm1, %vm183_vm2  ;;  %vm175_vm1 = vcmp.lt.s32.totalorder %v79_v22, 3  ;;  %vm125_vm6 = vcmp.ge.s32.totalorder %v77_v23, 0 }
  0x49   :  { %670 = vmatpush3.msk.msra.mxu1 %vm231_vm9, %v757_v24  ;;  %vm227_vm11 = vmand %vm131_vm3, %vm179_vm4  ;;  %vm177_vm3 = vcmp.lt.s32.totalorder %v81_v3, 3  ;;  %vm173_vm9 = vcmp.lt.s32.totalorder %v77_v23, 3 }
  0x4a   :  { %604 = vmatprep.subr.msk.mxu0 %vm227_vm11, %v757_v24  ;;  %671 = vmatprep.subr.mxu1 %v755_v1  ;;  %vm226_vm14 = vmand %vm130_vm7, %vm178_vm8  ;;  %vm124_vm8 = vcmp.ge.s32.totalorder %v76_v25, 0  ;;  %vm172_vm11 = vcmp.lt.s32.totalorder %v76_v25, 3 }
  0x4b   :  { %605 = vmatpush1.msk.msra.mxu0 %vm226_vm14, %v757_v24  ;;  %vm228_vm2 = vmand %vm132_vm10, %vm180_vm13  ;;  %vm126_vm10 = vcmp.ge.s32.totalorder %v78_v26, 0  ;;  %vm174_vm13 = vcmp.lt.s32.totalorder %v78_v26, 3 }
  0x4c   :  { %672 = vmatpush3.msk.msra.mxu1 %vm228_vm2, %v757_v24  ;;  %vm224_vm4 = vmand %vm128_vm12, %vm176_vm0  ;;  %vm37_vm0 = vcmp.lt.u32.totalorder %v36_v2, 3221225472 }
  0x4d   :  { %606 = vmatprep.subr.msk.mxu0 %vm224_vm4, %v757_v24  ;;  %673 = vmatprep.subr.mxu1 %v755_v1  ;;  %vm223_vm7 = vmand %vm127_vm15, %vm175_vm1 }
  0x4e   :  { %607 = vmatpush1.msk.msra.mxu0 %vm223_vm7, %v757_v24  ;;  %vm225_vm14 = vmand %vm129_vm5, %vm177_vm3 }
  0x4f   :  { %674 = vmatpush3.msk.msra.mxu1 %vm225_vm14, %v757_v24  ;;  %vm221_vm2 = vmand %vm125_vm6, %vm173_vm9 }
  0x50   :  { %608 = vmatprep.subr.msk.mxu0 %vm221_vm2, %v757_v24  ;;  %675 = vmatprep.subr.mxu1 %v755_v1  ;;  %vm220_vm12 = vmand %vm124_vm8, %vm172_vm11 }
  0x51   :  { %609 = vmatpush1.msk.msra.mxu0 %vm220_vm12, %v757_v24  ;;  %vm222_vm4 = vmand %vm126_vm10, %vm174_vm13 }
  0x52   :  { %676 = vmatpush3.msk.msra.mxu1 %vm222_vm4, %v757_v24  ;;  %610 = vmatmul.mubr.msk.f32.vlgmr.msra.gmra.mxu0 %vm37_vm0, %v758_v4 }
  0x53   :  { %678 = vmatmul.mubr.msk.f32.vlgmr.msra.gmra.mxu1 %vm37_vm0, %v758_v4 }
 0x112   :  { %v430_v28 = vpop.f32.mrf.mxu0 }
 0x113   :  { %v508_v30 = vmul.f32 %v505_v6, %v430_v28  ;;  %v501_v31 = vpop.f32.mrf.mxu1 }
 0x114   :  { %v510_v32 = vmul.f32 %v507_v27, %v501_v31  ;;  %v432_v33 = vpop.f32.mrf.mxu0 }
 0x115   :  { %511 = vst [vmem:[#allocation7] sm:$0xff] %v508_v30  ;;  %v509_v1 = vmul.f32 %v506_v29, %v432_v33  ;;  %v679_v34 = vpop.f32.mrf.mxu1 }
 0x116   :  { %513 = vst [vmem:[#allocation7 + $0x10] sm:$0xff] %v510_v32 }
 0x117   :  { %512 = vst [vmem:[#allocation7 + $0x8] sm:$0xff] %v509_v1 }
 0x118   :  { %738 = shalt.err (!%p735_p0)
}
 0x119   :  { %523 = dma.vmem_to_hbm [thread:$0]  %s521_s1, 384, %s999_s2, [#allocation4]  }
 0x11a   :  { %751 = dma.done.wait [#allocation4], 384  }
 0x11b   :  { %752 = vsyncadd [#allocation4], 4294966912 }
 0x11c   :  { %527 = vsyncpa [#allocation3], 1 }
 0x11d   :  { %528 = vsyncpa [#allocation6], 1 }
 0x11e   :  { %529 = vsyncpa [#allocation4], 1 }

</bundles_post_ra>
